<compile_context>
chip_gen: v7x
topology: tpu7x:2x2x1
jax: 0.10.0
libtpu: 0.0.40
codegen_flags: <defaults>
</compile_context>

<pallas_src>
import functools
import math

import jax
import jax.numpy as jnp
from jax.experimental import pallas as pl
from jax.experimental.pallas import tpu as pltpu


def _round_up(n, m):
    return ((n + m - 1) // m) * m


def _gmm_log_prob_kernel(xt_ref, w_ref, mup_ref, sel_ref, const_ref, out_ref):
    # xt_ref:    (D, TN)    transposed sample tile (samples on lanes)
    # w_ref:     (K*D, D)   stacked P_k^T
    # mup_ref:   (K*D, 1)   precomputed mu_k @ P_k (flattened)
    # sel_ref:   (K, K*D)   group-sum selector
    # const_ref: (K, 1)     per-component additive constant
    # out_ref:   (1, TN)    per-sample log-likelihood (lane-dense)
    xt = xt_ref[...]
    w = w_ref[...]
    mup = mup_ref[...]
    sel = sel_ref[...]
    const = const_ref[...]

    # One fused MXU matmul for all K components: y[k*D+e, n] = (x_n @ P_k)[e]
    y = jnp.dot(w, xt, preferred_element_type=jnp.float32)          # (K*D, TN)
    d = y - mup                                                      # lane-bcast
    # Per-component squared Mahalanobis distance via a group-sum matmul.
    sq = jnp.dot(sel, d * d, preferred_element_type=jnp.float32)     # (K, TN)
    lp = const - 0.5 * sq                                            # (K, TN)

    # logsumexp over components (small sublane reduction).
    m = jnp.max(lp, axis=0, keepdims=True)                           # (1, TN)
    out_ref[...] = m + jnp.log(
        jnp.sum(jnp.exp(lp - m), axis=0, keepdims=True))             # (1, TN)


@functools.partial(jax.jit, static_argnames=("tile_n",))
def gmm_log_likelihood(x, means, prec_chol, weights, *, tile_n=1024):
    """Log-likelihood of x under a full-covariance GMM (Pallas TPU kernel)."""
    x = x.astype(jnp.float32)
    means = means.astype(jnp.float32)
    prec_chol = prec_chol.astype(jnp.float32)
    weights = weights.astype(jnp.float32)

    N, D = x.shape
    K = means.shape[0]

    # compute_log_det_cholesky: sum of log of each Cholesky's diagonal.
    log_det = jnp.sum(
        jnp.log(jnp.diagonal(prec_chol, axis1=-2, axis2=-1)), axis=-1)   # (K,)
    const = (jnp.log(weights) + log_det
             - 0.5 * D * math.log(2.0 * math.pi))[:, None]               # (K, 1)

    # Fused weight matrix: W[k*D+e, d] = prec_chol[k, d, e].
    w = jnp.transpose(prec_chol, (0, 2, 1)).reshape(K * D, D)            # (K*D, D)

    # mu_k @ P_k hoisted out of the kernel (independent of x).
    mup = jnp.einsum("kd,kde->ke", means, prec_chol).reshape(K * D, 1)   # (K*D, 1)

    # Group-sum selector: sel[k, j] = 1 iff j // D == k.
    sel = jnp.repeat(jnp.eye(K, dtype=jnp.float32), D, axis=1)           # (K, K*D)

    # Lane tile: multiple of 128, capped by (padded) N so small problems do not
    # over-pad; large problems get big tiles to amortize per-step overhead.
    tile = min(int(tile_n), _round_up(N, 128))
    tile = max(128, (tile // 128) * 128)
    n_pad = _round_up(N, tile)

    # Transpose so samples ride the lane axis; zero-pad the tail (padded
    # columns produce finite garbage that is sliced off below).
    xt = jnp.pad(x.T, ((0, 0), (0, n_pad - N)))                          # (D, n_pad)

    grid = (n_pad // tile,)
    out = pl.pallas_call(
        _gmm_log_prob_kernel,
        out_shape=jax.ShapeDtypeStruct((1, n_pad), jnp.float32),
        grid_spec=pl.GridSpec(
            grid=grid,
            in_specs=[
                pl.BlockSpec((D, tile), lambda i: (0, i)),        # x^T tile
                pl.BlockSpec((K * D, D), lambda i: (0, 0)),       # W (full)
                pl.BlockSpec((K * D, 1), lambda i: (0, 0)),       # mu@P (full)
                pl.BlockSpec((K, K * D), lambda i: (0, 0)),       # selector
                pl.BlockSpec((K, 1), lambda i: (0, 0)),           # const
            ],
            out_specs=pl.BlockSpec((1, tile), lambda i: (0, i)),  # lane-dense
        ),
        compiler_params=pltpu.CompilerParams(
            dimension_semantics=("parallel",)),
    )(xt, w, mup, sel, const)
    return out[0, :N]


class TimeDependentGMMPallas:
    """JAX/Pallas equivalent of TimeDependentGMM.forward."""

    def __init__(self, intervals, params):
        # params: list of (means (K_i,D), prec_chol (K_i,D,D), weights (K_i,))
        self.intervals = intervals
        self.params = params

    def __call__(self, x, t):
        t1 = None
        for i, (t0, t1) in enumerate(self.intervals):
            if t0 <= t < t1:
                m, p, w = self.params[i]
                return gmm_log_likelihood(x, m, p, w)
        if t == t1:
            m, p, w = self.params[-1]
            return gmm_log_likelihood(x, m, p, w)
        raise ValueError


def _make_gmm_params(key, n_components, n_features):
    """Deterministic synthetic GMM parameters (in place of sklearn fitting)."""
    # TODO(synk): reference fits sklearn GaussianMixture per time interval;
    # fitting has no Pallas equivalent, so parameters are synthesized here.
    k1, k2, k3, k4 = jax.random.split(key, 4)
    means = jax.random.normal(k1, (n_components, n_features), jnp.float32)
    off = 0.1 * jnp.triu(
        jax.random.normal(k2, (n_components, n_features, n_features),
                          jnp.float32), k=1)
    diag = 0.5 + jax.nn.softplus(
        jax.random.normal(k3, (n_components, n_features), jnp.float32))
    prec_chol = off + jax.vmap(jnp.diag)(diag)
    weights = jax.nn.softmax(
        jax.random.normal(k4, (n_components,), jnp.float32))
    return means, prec_chol, weights


def _ref_log_likelihood(x, means, prec_chol, weights):
    """Pure-JAX reference matching GaussianMixtureModel.forward."""
    D = x.shape[1]
    log_det = jnp.sum(
        jnp.log(jnp.diagonal(prec_chol, axis1=-2, axis2=-1)), axis=-1)
    y = (jnp.einsum('nd,kde->nke', x, prec_chol)
         - jnp.einsum('kd,kde->ke', means, prec_chol)[None])
    sq = jnp.sum(y * y, axis=-1)                                   # (N, K)
    comp = -0.5 * (D * jnp.log(2.0 * jnp.pi) + sq) + log_det[None]
    lp = jnp.log(weights)[None] + comp
    return jax.scipy.special.logsumexp(lp, axis=-1)


if __name__ == "__main__":
    key = jax.random.PRNGKey(0)

    N, D = 16, 8                         # n_samples, n_features
    intervals = [(0.0, 0.5), (0.5, 1.0)]
    n_components_list = [3, 4]

    pkeys = jax.random.split(key, len(intervals) + 2)
    params = [
        _make_gmm_params(pkeys[i], n_components_list[i], D)
        for i in range(len(intervals))
    ]
    model = TimeDependentGMMPallas(intervals, params)

    x = jax.random.normal(pkeys[-2], (N, D), jnp.float32)

    # Exercise an interior t (first interval), a second-interval t and the
    # terminal t == t1 branch.
    for t, gmm_idx in [(0.25, 0), (0.7, 1), (1.0, 1)]:
        out = jax.block_until_ready(model(x, t))
        ref = _ref_log_likelihood(x, *params[gmm_idx])
        assert out.shape == (N,)
        assert jnp.allclose(out, ref, rtol=1e-4, atol=1e-4), (
            f"mismatch at t={t}: max err {jnp.max(jnp.abs(out - ref))}")

    # Exercise tail padding + a multi-step grid (N not a multiple of the tile).
    N2 = 300
    x2 = jax.random.normal(pkeys[-1], (N2, D), jnp.float32)
    m0, p0, w0 = params[0]
    out2 = jax.block_until_ready(
        gmm_log_likelihood(x2, m0, p0, w0, tile_n=128))
    ref2 = _ref_log_likelihood(x2, m0, p0, w0)
    assert out2.shape == (N2,)
    assert jnp.allclose(out2, ref2, rtol=1e-4, atol=1e-4), (
        f"padded-grid mismatch: max err {jnp.max(jnp.abs(out2 - ref2))}")

    print("KERNEL_OK")
</pallas_src>

<mosaic_0001>
module attributes {stable_mosaic.version = 11 : i64} {
  func.func @_gmm_log_prob_kernel(%arg0: i32, %arg1: memref<8x128xf32, #tpu.memory_space<vmem>>, %arg2: memref<24x8xf32, #tpu.memory_space<vmem>>, %arg3: memref<24x1xf32, #tpu.memory_space<vmem>>, %arg4: memref<3x24xf32, #tpu.memory_space<vmem>>, %arg5: memref<3x1xf32, #tpu.memory_space<vmem>>, %arg6: memref<1x128xf32, #tpu.memory_space<vmem>>) attributes {dimension_semantics = [#tpu.dimension_semantics<parallel>], iteration_bounds = array<i64: 1>, scalar_prefetch = 0 : i64, scratch_operands = 0 : i64, tpu.core_type = #tpu.core_type<tc>, window_params = [{transform_indices = @transform_0, window_bounds = array<i64: 8, 128>}, {pipeline_mode = #tpu.pipeline_mode<synchronous>, transform_indices = @transform_1, window_bounds = array<i64: 24, 8>}, {pipeline_mode = #tpu.pipeline_mode<synchronous>, transform_indices = @transform_2, window_bounds = array<i64: 24, 1>}, {pipeline_mode = #tpu.pipeline_mode<synchronous>, transform_indices = @transform_3, window_bounds = array<i64: 3, 24>}, {pipeline_mode = #tpu.pipeline_mode<synchronous>, transform_indices = @transform_4, window_bounds = array<i64: 3, 1>}, {transform_indices = @transform_5, window_bounds = array<i64: 1, 128>}]} {
    %c0 = arith.constant 0 : index
    %c0_0 = arith.constant 0 : index
    %0 = vector.load %arg1[%c0, %c0_0] : memref<8x128xf32, #tpu.memory_space<vmem>>, vector<8x128xf32>
    %c0_1 = arith.constant 0 : index
    %c0_2 = arith.constant 0 : index
    %1 = vector.load %arg2[%c0_1, %c0_2] : memref<24x8xf32, #tpu.memory_space<vmem>>, vector<24x8xf32>
    %c0_3 = arith.constant 0 : index
    %c0_4 = arith.constant 0 : index
    %2 = vector.load %arg3[%c0_3, %c0_4] : memref<24x1xf32, #tpu.memory_space<vmem>>, vector<24x1xf32>
    %c0_5 = arith.constant 0 : index
    %c0_6 = arith.constant 0 : index
    %3 = vector.load %arg4[%c0_5, %c0_6] : memref<3x24xf32, #tpu.memory_space<vmem>>, vector<3x24xf32>
    %c0_7 = arith.constant 0 : index
    %c0_8 = arith.constant 0 : index
    %4 = vector.load %arg5[%c0_7, %c0_8] : memref<3x1xf32, #tpu.memory_space<vmem>>, vector<3x1xf32>
    %cst = arith.constant dense<0.000000e+00> : vector<24x128xf32>
    %5 = tpu.matmul %1, %0, %cst {dimension_numbers = #tpu.dot_dimension_numbers<[1], [0], [0], [1], [0, 0, 1, 1], [], []>} : vector<24x8xf32>, vector<8x128xf32>, vector<24x128xf32> -> vector<24x128xf32>
    %6 = vector.broadcast %2 : vector<24x1xf32> to vector<24x128xf32>
    %7 = arith.subf %5, %6 : vector<24x128xf32>
    %8 = arith.mulf %7, %7 : vector<24x128xf32>
    %cst_9 = arith.constant dense<0.000000e+00> : vector<3x128xf32>
    %9 = tpu.matmul %3, %8, %cst_9 {dimension_numbers = #tpu.dot_dimension_numbers<[1], [0], [0], [1], [0, 0, 1, 1], [], []>} : vector<3x24xf32>, vector<24x128xf32>, vector<3x128xf32> -> vector<3x128xf32>
    %cst_10 = arith.constant 5.000000e-01 : f32
    %10 = vector.broadcast %cst_10 : f32 to vector<3x128xf32>
    %11 = arith.mulf %10, %9 : vector<3x128xf32>
    %12 = vector.broadcast %4 : vector<3x1xf32> to vector<3x128xf32>
    %13 = arith.subf %12, %11 : vector<3x128xf32>
    %cst_11 = arith.constant dense<0xFF800000> : vector<128xf32>
    %14 = vector.multi_reduction <maximumf>, %13, %cst_11 [0] : vector<3x128xf32> to vector<128xf32>
    %15 = vector.shape_cast %14 : vector<128xf32> to vector<1x128xf32>
    %16 = vector.broadcast %15 : vector<1x128xf32> to vector<3x128xf32>
    %17 = arith.subf %13, %16 : vector<3x128xf32>
    %18 = math.exp %17 : vector<3x128xf32>
    %cst_12 = arith.constant dense<0.000000e+00> : vector<128xf32>
    %19 = vector.multi_reduction <add>, %18, %cst_12 [0] : vector<3x128xf32> to vector<128xf32>
    %20 = vector.shape_cast %19 : vector<128xf32> to vector<1x128xf32>
    %21 = math.log %20 : vector<1x128xf32>
    %22 = arith.addf %15, %21 : vector<1x128xf32>
    %c0_13 = arith.constant 0 : index
    %c0_14 = arith.constant 0 : index
    %23 = vector.load %arg6[%c0_13, %c0_14] : memref<1x128xf32, #tpu.memory_space<vmem>>, vector<1x128xf32>
    tpu.vector_store %arg6[%c0_13, %c0_14], %22 {strides = array<i32>} : memref<1x128xf32, #tpu.memory_space<vmem>>, vector<1x128xf32>,
    return
  }
  func.func @transform_0(%arg0: i32) -> (i32, i32) {
    %c0_i32 = arith.constant 0 : i32
    %c0_i32_0 = arith.constant 0 : i32
    return %c0_i32, %arg0 : i32, i32
  }
  func.func @transform_1(%arg0: i32) -> (i32, i32) {
    %c0_i32 = arith.constant 0 : i32
    %c0_i32_0 = arith.constant 0 : i32
    %c0_i32_1 = arith.constant 0 : i32
    return %c0_i32, %c0_i32_0 : i32, i32
  }
  func.func @transform_2(%arg0: i32) -> (i32, i32) {
    %c0_i32 = arith.constant 0 : i32
    %c0_i32_0 = arith.constant 0 : i32
    %c0_i32_1 = arith.constant 0 : i32
    return %c0_i32, %c0_i32_0 : i32, i32
  }
  func.func @transform_3(%arg0: i32) -> (i32, i32) {
    %c0_i32 = arith.constant 0 : i32
    %c0_i32_0 = arith.constant 0 : i32
    %c0_i32_1 = arith.constant 0 : i32
    return %c0_i32, %c0_i32_0 : i32, i32
  }
  func.func @transform_4(%arg0: i32) -> (i32, i32) {
    %c0_i32 = arith.constant 0 : i32
    %c0_i32_0 = arith.constant 0 : i32
    %c0_i32_1 = arith.constant 0 : i32
    return %c0_i32, %c0_i32_0 : i32, i32
  }
  func.func @transform_5(%arg0: i32) -> (i32, i32) {
    %c0_i32 = arith.constant 0 : i32
    %c0_i32_0 = arith.constant 0 : i32
    return %c0_i32, %arg0 : i32, i32
  }
}

</mosaic_0001>

<bundles_post_ra>
// kernel: gmm_log_likelihood.1
= control target key start
LH: loop header
LB: loop body
LE: loop exit
PB: predicated region body
PF: predicated region fallthrough
CT: control target
= control target key end

     0   :  { %vm29_vm0 = vcmask 64512   ;;  %v292_v0 = vmov 0.0   ;;  %vm293_vm1 = vmmov 0   ;;  %v294_v3 = vmov 0   ;;  %s363_s0 = inlined_call_operand.vmem [shape: f32[8,128], index: 0, kind: input, shape index: {}]   ;;  %s364_s1 = inlined_call_operand.vmem [shape: f32[24,8], index: 1, kind: input, shape index: {}]   ;;  %s365_s2 = inlined_call_operand.vmem [shape: f32[24,1], index: 2, kind: input, shape index: {}]   ;;  %s366_s4 = inlined_call_operand.vmem [shape: f32[3,1], index: 4, kind: input, shape index: {}]   ;;  %s367_s3 = inlined_call_operand.vmem [shape: f32[3,24], index: 3, kind: input, shape index: {}]   ;;  %s368_s5 = inlined_call_operand.vmem [shape: f32[1,128], index: 5, kind: output, shape index: {}]  }
   0x1   :  { %259 = vmatprep.subr.mxu0 %v292_v0  ;;  %v20_v1 = vld [vmem:[%s363_s0] sm:$0xff]  ;;  %261 = vmatprep.mubr.msk.f32.mxu0 %vm293_vm1, %v292_v0  ;;  %v26_v5 = vld [vmem:[%s365_s2 + $0x10] sm:$0xff]  ;;  %v22_v6 = vld [vmem:[%s364_s1 + $0x8] sm:$0xff]  ;;  %v295_v10 = vmov 0.0|0.0   ;;  %vm140_vm2 = vcmask 195584   ;;  %vm221_vm3 = vcmask 1042432  }
   0x2   :  { %v21_v2 = vld [vmem:[%s364_s1] sm:$0xff]  ;;  %260 = vmatpush3.msra.mxu0 %v20_v1  ;;  %286 = vset.pattern.permute.xlu0 %v294_v3  ;;  %v25_v7 = vld [vmem:[%s365_s2 + $0x8] sm:$0xff]  ;;  %v23_v9 = vld [vmem:[%s364_s1 + $0x10] sm:$0xff] }
   0x3   :  { %v24_v4 = vld [vmem:[%s365_s2] sm:$0xff]  ;;  %262 = vmatmul.mubr.msk.f32.vlgmr.msra.gmra.mrb[0].mxu0 %vm29_vm0, %v21_v2  ;;  %287 = vset.pattern.permute.xlu1 %v294_v3 }
   0x4   :  { %121 = vperm.xlu0 %286, %v24_v4   ;;  %264 = vmatprep.mubr.msk.f32.mxu0 %vm293_vm1, %v292_v0  ;;  %v28_v8 = vld [vmem:[%s366_s4] sm:$0x7] }
   0x5   :  { %131 = vperm.xlu1 %287, %v26_v5   ;;  %276 = vmatprep.mubr.msk.f32.mxu1 %vm293_vm1, %v292_v0  ;;  %v27_v27 = vld [vmem:[%s367_s3] sm:$0x7] }
   0x6   :  { %279 = vmatprep.subr.bf16.mxu1 %v295_v10 }
   0x7   :  { %265 = vmatmul.mubr.msk.f32.gmra.mrb[2].mxu0 %vm29_vm0, %v22_v6 }
   0x8   :  { %126 = vperm.xlu0 %286, %v25_v7   ;;  %267 = vmatprep.mubr.msk.f32.mxu0 %vm293_vm1, %v292_v0 }
   0x9   :  { %217 = vperm.xlu1 %287, %v28_v8  }
   0xb   :  { %268 = vmatmul.mubr.msk.f32.gmra.mrb[4].mxu0 %vm29_vm0, %v23_v9 }
  0x83   :  { %v122_v11 = vpop.permute.xlu0 %121 }
  0x84   :  { %v132_v21 = vpop.permute.xlu1 %131 }
  0x87   :  { %v127_v15 = vpop.permute.xlu0 %126 }
  0x88   :  { %v218_v31 = vpop.permute.xlu1 %217 }
  0xd6   :  { %v105_v12 = vpop.f32.mrb[0].mxu0 }
  0xd7   :  { %v263_v13 = vpop.f32.mrb[1].mxu0  ;;  %v134_v14 = vsub.f32 %v105_v12, %v122_v11 }
  0xd9   :  { %v137_v19 = vmul.f32 %v134_v14, %v134_v14 }
  0xda   :  { %v110_v16 = vpop.f32.mrb[2].mxu0 }
  0xdb   :  { %v135_v17 = vsub.f32 %v110_v16, %v127_v15  ;;  %v266_v18 = vpop.f32.mrb[3].mxu0 }
  0xdd   :  { %v138_v20 = vmul.f32 %v135_v17, %v135_v17 }
  0xde   :  { %v115_v22 = vpop.f32.mrb[4].mxu0 }
  0xdf   :  { %v136_v23 = vsub.f32 %v115_v22, %v132_v21  ;;  %v269_v24 = vpop.f32.mrb[5].mxu0  ;;  %v280_v25 = vpack.c.bf16 %v138_v20, %v137_v19 }
  0xe1   :  { %v139_v26 = vmul.f32 %v136_v23, %v136_v23  ;;  %281 = vmatpush3.bf16.msra.mxu1 %v280_v25 }
  0xe2   :  { %274 = vmatprep.subr.mxu1 %v292_v0 }
  0xe5   :  { %275 = vmatpush3.msra.mxu1 %v139_v26 }
  0xe6   :  { %277 = vmatmul.mubr.msk.f32.vlgmr.msra.gmra.mrb[0].mxu1 %vm140_vm2, %v27_v27 }
 0x1b9   :  { %v210_v28 = vpop.f32.mrb[0].mxu1 }
 0x1ba   :  { %v214_v29 = vmul.f32 0.5, %v210_v28  ;;  %v278_v30 = vpop.f32.mrb[1].mxu1 }
 0x1bc   :  { %v220_v32 = vsub.f32 %v218_v31, %v214_v29 }
 0x1be   :  { %v222_v33 = vsel %vm221_vm3, %v220_v32, -inf }
 0x1bf   :  { %v223_v34 = vrot.slane %v222_v33, 4 }
 0x1c1   :  { %v224_v35 = vmax.f32 %v222_v33, %v223_v34 }
 0x1c3   :  { %v225_v36 = vrot.slane %v224_v35, 2 }
 0x1c5   :  { %v226_v37 = vmax.f32 %v224_v35, %v225_v36 }
 0x1c7   :  { %v227_v38 = vrot.slane %v226_v37, 1 }
 0x1c9   :  { %v228_v39 = vmax.f32 %v226_v37, %v227_v38 }
 0x1cb   :  { %v229_v40 = vsub.f32 %v220_v32, %v228_v39 }
 0x1cd   :  { %v230_v41 = vmul.f32 1.442695, %v229_v40 }
 0x1cf   :  { %288 = vpow2.f32 %v230_v41 }
 0x1d9   :  { %v289_v42 = vpop.eup %288 }
 0x1da   :  { %v232_v43 = vsel %vm221_vm3, %v289_v42, 0.0 }
 0x1db   :  { %v233_v44 = vrot.slane %v232_v43, 4 }
 0x1dd   :  { %v234_v45 = vadd.f32 %v233_v44, %v232_v43 }
 0x1df   :  { %v235_v46 = vrot.slane %v234_v45, 2 }
 0x1e1   :  { %v236_v47 = vadd.f32 %v235_v46, %v234_v45 }
 0x1e3   :  { %v237_v48 = vrot.slane %v236_v47, 1 }
 0x1e5   :  { %v238_v49 = vadd.f32 %v237_v48, %v236_v47 }
 0x1e7   :  { %290 = vlog2.f32 %v238_v49 }
 0x1f1   :  { %v291_v50 = vpop.eup %290 }
 0x1f2   :  { %v240_v51 = vmul.f32 0.6931472, %v291_v50 }
 0x1f4   :  { %v241_v52 = vadd.f32 %v240_v51, %v228_v39 }
 0x1f6   :  { %242 = vst [vmem:[%s368_s5] sm:$0x1] %v241_v52 }

</bundles_post_ra>
